<compile_context>
chip_gen: v7x
topology: tpu7x:2x2x1
jax: 0.10.0
libtpu: 0.0.40
codegen_flags: <defaults>
</compile_context>

<pallas_src>
import functools
import math

import jax
import jax.numpy as jnp
from jax.experimental import pallas as pl
from jax.experimental.pallas import tpu as pltpu


# --------------------------------------------------------------------------- kernels
def _pool_only_kernel(x_ref, o_ref, *, f, inv_area):
    """Fused n-stage 0.5x bilinear (== 2^n x 2^n avg pool), no channel remap.

    x_ref: (C, th*f, W)  NCHW tile (batch squeezed)
    o_ref: (C, th, W//f) NCHW tile -> written directly, zero wrapper transposes.
    """
    C, hf, W = x_ref.shape
    th, Wp = hf // f, W // f
    x = x_ref[...].astype(jnp.float32)                      # single upcast (v5e: no bf16 VPU)
    pooled = x.reshape(C, th, f, Wp, f).sum(axis=(2, 4)) * inv_area
    o_ref[...] = pooled.astype(o_ref.dtype)


def _pool_conv_kernel(x_ref, w_ref, o_ref, *, f):
    """Fused n-stage 0.5x bilinear + 1x1 conv (channel matmul).

    x_ref: (C, th*f, W)   NCHW input tile (batch squeezed)
    w_ref: (C, C_out)     conv weight, pre-scaled by 1/f^2, VMEM-resident across the grid
    o_ref: (th, W//f, C_out)  channels-last tile (C_out on lanes for the MXU writeback)
    """
    C, hf, W = x_ref.shape
    th, Wp = hf // f, W // f
    x = x_ref[...].astype(jnp.float32)
    if f > 1:
        pooled = x.reshape(C, th, f, Wp, f).sum(axis=(2, 4))   # (C, th, Wp), f32 window sums
    else:                                                      # n_stages == 0: pure 1x1 conv
        pooled = x
    # spatial-flattened M on sublanes, channels as the (tiny) contraction K
    m = pooled.transpose(1, 2, 0).reshape(th * Wp, C)          # small tile, in-kernel relayout
    y = jnp.dot(m, w_ref[...].astype(jnp.float32),
                preferred_element_type=jnp.float32)            # (M, C_out) on the MXU
    o_ref[...] = y.reshape(th, Wp, -1).astype(o_ref.dtype)


# --------------------------------------------------------------------------- tiling
def _pick_row_tile(Hp, f, C, W, itemsize, budget_bytes=4 << 20):
    """Largest output-row tile `th` dividing Hp such that the input slab
    C*(th*f)*W fits a conservative per-buffer VMEM budget (double-buffered by the
    pipeline) and block shapes satisfy the (8, 128) sublane rule (th == Hp or th % 8 == 0).
    """
    def ok(th):
        return (th == Hp or th % 8 == 0) and C * th * f * W * itemsize <= budget_bytes

    if ok(Hp):
        return Hp
    for th in range(Hp - 1, 0, -1):
        if Hp % th == 0 and ok(th):
            return th
    return Hp  # nothing smaller divides cleanly; fall back to full rows (still correct)


# --------------------------------------------------------------------------- module
class SpatialRescaler:
    """Pallas-TPU port of ldm.modules.encoders.modules.SpatialRescaler.

    Supported: method in ('bilinear', 'area'), multiplier == 0.5, bias == False,
    spatial dims divisible by 2**n_stages (so every intermediate stage is even,
    which is what makes bilinear-0.5x exactly an average pool).
    """

    def __init__(self, n_stages=1, method="bilinear", multiplier=0.5,
                 in_channels=3, out_channels=None, bias=False, *,
                 key=None, param_dtype=jnp.float32):
        assert n_stages >= 0
        assert method in ("bilinear", "area"), (
            "only 0.5x bilinear / area (== 2x2 average pool) is implemented")
        assert multiplier == 0.5, "only multiplier=0.5 is implemented"
        assert not bias, "Conv2d bias=True not implemented"
        self.n_stages = n_stages
        self.factor = 2 ** n_stages
        self.in_channels = in_channels
        self.out_channels = out_channels
        self.remap_output = out_channels is not None
        if self.remap_output:
            key = jax.random.PRNGKey(0) if key is None else key
            # Conv2d(in, out, 1) weight is (out, in, 1, 1) in torch; stored here as
            # (in, out) so the kernel contracts channels as (M, C_in) @ (C_in, C_out).
            bound = 1.0 / math.sqrt(in_channels)
            self.weight = jax.random.uniform(
                key, (in_channels, out_channels), param_dtype, -bound, bound)
        else:
            self.weight = None

    def __call__(self, x):
        return self.forward(x)

    def encode(self, x):
        return self(x)

    def forward(self, x):
        B, C, H, W = x.shape
        assert C == self.in_channels
        f = self.factor
        assert H % f == 0 and W % f == 0, (
            "spatial dims must be divisible by 2**n_stages for the exact "
            "bilinear-0.5x == avg-pool identity (incl. intermediate stages)")

        if f == 1 and not self.remap_output:
            return x                                        # n_stages == 0, no remap: identity

        Hp, Wp = H // f, W // f
        th = _pick_row_tile(Hp, f, C, W, x.dtype.itemsize)
        grid = (B, Hp // th)
        # Full-res input is consumed in its native NCHW layout — no wrapper transpose.
        in_spec = pl.BlockSpec((None, C, th * f, W), lambda b, r: (b, 0, r, 0))
        cparams = pltpu.CompilerParams(
            dimension_semantics=("parallel", "parallel"))   # independent tiles -> 2-TC on v7x

        if self.remap_output:
            # Fold the 1/f^2 average into the conv weight: the kernel only sums.
            w = self.weight.astype(jnp.float32) / float(f * f)
            Cout = self.out_channels
            y = pl.pallas_call(
                functools.partial(_pool_conv_kernel, f=f),
                out_shape=jax.ShapeDtypeStruct((B, Hp, Wp, Cout), x.dtype),
                grid=grid,
                in_specs=[
                    in_spec,
                    # weight: single block, same index every grid step -> VMEM-resident
                    pl.BlockSpec((C, Cout), lambda b, r: (0, 0)),
                ],
                out_specs=pl.BlockSpec((None, th, Wp, Cout), lambda b, r: (b, r, 0, 0)),
                compiler_params=cparams,
            )(x, w)
            # Only the small (4^n x smaller) output is transposed back to NCHW.
            return jnp.transpose(y, (0, 3, 1, 2))

        return pl.pallas_call(
            functools.partial(_pool_only_kernel, f=f, inv_area=1.0 / float(f * f)),
            out_shape=jax.ShapeDtypeStruct((B, C, Hp, Wp), x.dtype),
            grid=grid,
            in_specs=[in_spec],
            out_specs=pl.BlockSpec((None, C, th, Wp), lambda b, r: (b, 0, r, 0)),
            compiler_params=cparams,
        )(x)


# --------------------------------------------------------------------------- reference
def _reference(x, n_stages, weight):
    """Pure-JAX reference: n stages of 2x2 avg pool (== 0.5x bilinear) + optional 1x1 conv."""
    f = 2 ** n_stages
    B, C, H, W = x.shape
    xp = x.astype(jnp.float32).reshape(B, C, H // f, f, W // f, f).mean(axis=(3, 5))
    if weight is not None:
        xp = jnp.einsum("bchw,co->bohw", xp, weight.astype(jnp.float32))
    return xp.astype(x.dtype)


# --------------------------------------------------------------------------- demo
if __name__ == "__main__":
    key = jax.random.PRNGKey(0)
    kx, kw = jax.random.split(key)
    B, C, H, W = 2, 4, 16, 16
    x = jax.random.normal(kx, (B, C, H, W), jnp.float32)

    # 1) two 0.5x bilinear stages fused with a 1x1 conv remap 4 -> 8 channels
    model = SpatialRescaler(n_stages=2, method="bilinear", multiplier=0.5,
                            in_channels=C, out_channels=8, bias=False, key=kw)
    y = jax.block_until_ready(model(x))
    assert y.shape == (B, 8, H // 4, W // 4), y.shape
    ref = _reference(x, 2, model.weight)
    assert jnp.allclose(y, ref, rtol=1e-4, atol=1e-4), float(jnp.max(jnp.abs(y - ref)))

    # 2) single 0.5x stage, no channel remap (NCHW output written directly by the kernel)
    model2 = SpatialRescaler(n_stages=1, in_channels=C, out_channels=None)
    y2 = jax.block_until_ready(model2(x))
    assert y2.shape == (B, C, H // 2, W // 2), y2.shape
    ref2 = _reference(x, 1, None)
    assert jnp.allclose(y2, ref2, rtol=1e-4, atol=1e-4), float(jnp.max(jnp.abs(y2 - ref2)))

    print("KERNEL_OK")
</pallas_src>

<mosaic_0001>
module attributes {stable_mosaic.version = 11 : i64} {
  func.func @_pool_conv_kernel(%arg0: i32, %arg1: i32, %arg2: memref<1x4x16x16xf32, #tpu.memory_space<vmem>>, %arg3: memref<4x8xf32, #tpu.memory_space<vmem>>, %arg4: memref<1x4x4x8xf32, #tpu.memory_space<vmem>>) attributes {dimension_semantics = [#tpu.dimension_semantics<parallel>, #tpu.dimension_semantics<parallel>], iteration_bounds = array<i64: 2, 1>, scalar_prefetch = 0 : i64, scratch_operands = 0 : i64, tpu.core_type = #tpu.core_type<tc>, window_params = [{transform_indices = @transform_0, window_bounds = array<i64: 1, 4, 16, 16>}, {pipeline_mode = #tpu.pipeline_mode<synchronous>, transform_indices = @transform_1, window_bounds = array<i64: 4, 8>}, {transform_indices = @transform_2, window_bounds = array<i64: 1, 4, 4, 8>}]} {
    %c0 = arith.constant 0 : index
    %c0_0 = arith.constant 0 : index
    %c0_1 = arith.constant 0 : index
    %c0_2 = arith.constant 0 : index
    %0 = vector.load %arg2[%c0, %c0_0, %c0_1, %c0_2] : memref<1x4x16x16xf32, #tpu.memory_space<vmem>>, vector<1x4x16x16xf32>
    %1 = vector.shape_cast %0 : vector<1x4x16x16xf32> to vector<4x16x16xf32>
    %2 = vector.shape_cast %1 : vector<4x16x16xf32> to vector<4x4x4x4x4xf32>
    %cst = arith.constant dense<0.000000e+00> : vector<4x4x4xf32>
    %3 = vector.multi_reduction <add>, %2, %cst [2, 4] : vector<4x4x4x4x4xf32> to vector<4x4x4xf32>
    %4 = tpu.transpose %3, [1, 2, 0] : vector<4x4x4xf32> -> vector<4x4x4xf32>
    %5 = vector.shape_cast %4 : vector<4x4x4xf32> to vector<16x4xf32>
    %c0_3 = arith.constant 0 : index
    %c0_4 = arith.constant 0 : index
    %6 = vector.load %arg3[%c0_3, %c0_4] : memref<4x8xf32, #tpu.memory_space<vmem>>, vector<4x8xf32>
    %cst_5 = arith.constant dense<0.000000e+00> : vector<16x8xf32>
    %7 = tpu.matmul %5, %6, %cst_5 {dimension_numbers = #tpu.dot_dimension_numbers<[1], [0], [0], [1], [0, 0, 1, 1], [], []>} : vector<16x4xf32>, vector<4x8xf32>, vector<16x8xf32> -> vector<16x8xf32>
    %8 = vector.shape_cast %7 : vector<16x8xf32> to vector<4x4x8xf32>
    %c0_6 = arith.constant 0 : index
    %c0_7 = arith.constant 0 : index
    %c0_8 = arith.constant 0 : index
    %c0_9 = arith.constant 0 : index
    %9 = vector.load %arg4[%c0_6, %c0_7, %c0_8, %c0_9] : memref<1x4x4x8xf32, #tpu.memory_space<vmem>>, vector<1x4x4x8xf32>
    %10 = vector.shape_cast %9 : vector<1x4x4x8xf32> to vector<4x4x8xf32>
    %11 = vector.shape_cast %8 : vector<4x4x8xf32> to vector<1x4x4x8xf32>
    tpu.vector_store %arg4[%c0_6, %c0_7, %c0_8, %c0_9], %11 {strides = array<i32>} : memref<1x4x4x8xf32, #tpu.memory_space<vmem>>, vector<1x4x4x8xf32>,
    return
  }
  func.func @transform_0(%arg0: i32, %arg1: i32) -> (i32, i32, i32, i32) {
    %c0_i32 = arith.constant 0 : i32
    %c0_i32_0 = arith.constant 0 : i32
    %c0_i32_1 = arith.constant 0 : i32
    return %arg0, %c0_i32, %arg1, %c0_i32_0 : i32, i32, i32, i32
  }
  func.func @transform_1(%arg0: i32, %arg1: i32) -> (i32, i32) {
    %c0_i32 = arith.constant 0 : i32
    %c0_i32_0 = arith.constant 0 : i32
    %c0_i32_1 = arith.constant 0 : i32
    return %c0_i32, %c0_i32_0 : i32, i32
  }
  func.func @transform_2(%arg0: i32, %arg1: i32) -> (i32, i32, i32, i32) {
    %c0_i32 = arith.constant 0 : i32
    %c0_i32_0 = arith.constant 0 : i32
    %c0_i32_1 = arith.constant 0 : i32
    return %arg0, %arg1, %c0_i32, %c0_i32_0 : i32, i32, i32, i32
  }
}

</mosaic_0001>

<bundles_post_ra>
// kernel: tpu_custom_call.1
= control target key start
LH: loop header
LB: loop body
LE: loop exit
PB: predicated region body
PF: predicated region fallthrough
CT: control target
= control target key end

     0   :  { %7 = vsyncpa [#allocation3], 0  ;;  %s2566_s0 = inlined_call_operand.hbm [shape: f32[2,4,16,16], index: 0, kind: input, shape index: {}]   ;;  %s2567_s1 = inlined_call_operand.hbm [shape: f32[4,8], index: 1, kind: input, shape index: {}]   ;;  %s2568_s2 = inlined_call_operand.hbm [shape: f32[2,4,4,8], index: 2, kind: output, shape index: {}]  }
   0x1   :  { %9 = vsyncpa [#allocation3 + $0x1], 0 }
   0x2   :  { %10 = vsyncpa [#allocation6], 0 }
   0x3   :  { %11 = vsyncpa [#allocation4], 0 }
   0x4   :  { %13 = vsyncpa [#allocation4 + $0x1], 0  ;;  %s1899_s9 = smov 0   ;;  %s1901_s10 = smov 0  }
   0x5   :  { %s1903_s11 = smov 0   ;;  %s1905_s12 = smov 0  }
   0x6   :  { %s1907_s13 = smov 0   ;;  %s1909_s14 = smov 0  }
   0x7 LB: > { %s1612_s15 = sadd.s32 4294967295, %s1869_s14   ;;  %s1613_s16 = sadd.s32 4294967294, %s1869_s14   ;;  %s1869_s14 = sphi %s1909_s14, %s19_s14   ;;  %s1865_s13 = sphi %s1907_s13, %s2596_s13   ;;  %s1861_s12 = sphi %s1905_s12, %s2595_s12   ;;  %s1857_s11 = sphi %s1903_s11, %s2594_s11   ;;  %s1853_s10 = sphi %s1901_s10, %s2593_s10   ;;  %s1849_s9 = sphi %s1899_s9, %s2592_s9  }
   0x8   : > { %s40_s17 = sadd.s32 1, %s1857_s11  ;;  %p47_p0 = scmp.ne.s32.totalorder %s1857_s11, %s1853_s10 }
   0x9   : > { %p48_p1 = scmp.eq.s32.totalorder %s1869_s14, 0  ;;  %p53_p2 = scmp.ne.s32.totalorder %s1853_s10, %s1849_s9 }
   0xa   : > { %p1937_p3 = scmp.eq.s32.totalorder %s1612_s15, 0  ;;  %p100_p4 = scmp.eq.s32.totalorder %s1612_s15, 1 }
   0xb   : > { %p1941_p5 = por %p48_p1, %p47_p0  ;;  %p106_p6 = scmp.eq.s32.totalorder %s1613_s16, 1 }
   0xc   : > { %s2575_s18 = scalar_select %p1937_p3, 1, 0 }
   0xd   : > { %p1947_p7 = por %p1937_p3, %p53_p2  ;;  %p1951_p8 = por %p100_p4, %p47_p0 }
   0xe   : > { %p1955_p9 = por %p106_p6, %p53_p2  ;;  %p1614_p10 = scmp.ge.s32.totalorder %s1869_s14, 1 }
   0xf   : > { %s2577_s20 = scalar_select %p1947_p7, 1, 0 }
  0x10   : > { %s2578_s21 = scalar_select %p1951_p8, 1, 0 }
  0x11   : > { %s2579_s22 = scalar_select %p1955_p9, 1, 0 }
  0x12   : > { %p113_p11 = scmp.lt.s32.totalorder %s1869_s14, 3  ;;  %s1871_s24 = smov [#allocation5]  }
  0x13   : > { %s126_s25 = sshll.u32 %s1871_s24, 4  ;;  %p1663_p1 = scmp.lt.s32.totalorder %s1869_s14, 2  ;;  %s127_s25 = int_to_ptr.vmem [resolvable:$true] %s126_s25 }
  0x14   : > { %p1962_p13 = pnand %p1614_p10, %p113_p11  ;;  %s31_s28 = sadd.s32 1, %s1865_s13 }
  0x15   : > { %p1971_p4 = pnand %p1663_p1, %p1941_p5  ;;  %p1982_p6 = scmp.ge.s32.totalorder %s31_s28, 2 }
  0x16   : > { %s2580_s23 = scalar_select %p1962_p13, 1, 0 }
  0x17   : > { %p1650_p0 = pneg %p1962_p13  ;;  %s137_s30 = sand.u32 1, %s1857_s11  }
  0x18   : > { %s2581_s26 = scalar_select %p1971_p4, 1, 0 }
  0x19   : > { %p1977_p2 = pnand %p1650_p0, %p1937_p3  ;;  %s1725_s5 = scalar_lea.hbm %s2567_s1, 64 }
  0x1a   : > { %s2583_s29 = scalar_select %p1982_p6, 1, 0 }
  0x1b   : > { %p1726_p5 = scmp.ne.s32.totalorder %s2567_s1, %s1725_s5  ;;  %p1727_p10 = pneg %p1977_p2 }
  0x1c   : > { %p1732_p0 = scmp.lt.u32.totalorder %s1725_s5, %s2567_s1 }
  0x1d   : > { %p1728_p11 = pnand %p1727_p10, %p1726_p5 }
  0x1f   : > { %p1729_p1 = pneg %p1728_p11 }
  0x21   : > { %p1734_p12 = pnand %p1732_p0, %p1729_p1 }
  0x23   : > { %1737 = shalt.err (!%p1734_p12)
}
  0x24   : > { %s1738_s16 = scalar_lea.vmem %s127_s25, 64  ;;  %p1746_p7 = scmp.lt.s32.totalorder %s127_s25, %s127_s25 }
  0x25   : > { %p1739_p9 = scmp.ne.s32.totalorder %s127_s25, %s1738_s16  ;;  %p1747_p13 = scmp.lt.s32.totalorder %s1738_s16, %s1738_s16 }
  0x27   : > { %p1741_p8 = pnand %p1739_p9, %p1727_p10  ;;  %p1748_p4 = por %p1747_p13, %p1746_p7 }
  0x29   : > { %p1742_p3 = pneg %p1741_p8 }
  0x2b   : > { %p1749_p6 = pnand %p1748_p4, %p1742_p3 }
  0x2d   : > { %1752 = shalt.err (!%p1749_p6)
}
  0x2e   : > { %1653 = dma.hbm_to_vmem [thread:$0]  (!%p1977_p2), %s2567_s1, 64, %s127_s25, [#allocation6]  }
  0x2f   : > { %p2584_p9 = scmp.ne.s32.totalorder %s2583_s29, 0  ;;  %s1617_s3 = sshll.u32 %s137_s30, 6 }
  0x30   : > { %s1632_s5 = sshll.u32 %s1865_s13, 10  ;;  %s141_s8 = scalar_lea.vmem [#allocation2], %s1617_s3 }
  0x31   : > { %s2598_s28 = smov (%p2584_p9, %s31_s28), 0  ;;  %s2013_s7 = scalar_lea.hbm %s2566_s0, %s1632_s5 }
  0x32   : > { %s35_s4 = ssub.s32 %s1865_s13, %s2598_s28  ;;  %s150_s15 = sshll.u32 %s141_s8, 4  ;;  %s2020_s15 = int_to_ptr.vmem [resolvable:$true] %s150_s15 }
  0x33   : > { %p38_p3 = scmp.eq.s32.totalorder %s35_s4, 0  ;;  %s2022_s29 = scalar_lea.sflag [#allocation3], %s137_s30 }
  0x34   : > { %s1753_s16 = scalar_lea.hbm %s2013_s7, 1024  ;;  %p2585_p8 = scmp.ne.s32.totalorder %s2581_s26, 0 }
  0x35   : > { %s2018_s25 = scalar_select %p38_p3, %s1857_s11, %s40_s17  }
  0x36   : > { %p1754_p7 = scmp.ne.s32.totalorder %s2013_s7, %s1753_s16  ;;  %p1755_p12 = pneg %p2585_p8 }
  0x37   : > { %s1758_s3 = scalar_lea.hbm %s2566_s0, 2048  ;;  %p1759_p2 = scmp.lt.u32.totalorder %s2013_s7, %s2566_s0 }
  0x38   : > { %p1756_p13 = pnand %p1755_p12, %p1754_p7  ;;  %p1760_p6 = scmp.lt.u32.totalorder %s1758_s3, %s1753_s16 }
  0x39   : > { %p1762_p10 = scmp.lt.u32.totalorder %s1753_s16, %s2013_s7 }
  0x3a   : > { %p1757_p4 = pneg %p1756_p13  ;;  %p1761_p5 = por %p1760_p6, %p1759_p2 }
  0x3c   : > { %p1763_p11 = por %p1762_p10, %p1761_p5 }
  0x3e   : > { %p1764_p1 = pnand %p1763_p11, %p1757_p4 }
  0x40   : > { %1767 = shalt.err (!%p1764_p1)
}
  0x41   : > { %s1768_s17 = scalar_lea.vmem %s2020_s15, 1024  ;;  %s1872_s30 = smov [#allocation2]  }
  0x42   : > { %p1769_p0 = scmp.ne.s32.totalorder %s2020_s15, %s1768_s17  ;;  %s1773_s27 = sshll.u32 %s1872_s30, 4  ;;  %s1774_s27 = int_to_ptr.vmem [resolvable:$false] %s1773_s27 }
  0x43   : > { %s1775_s6 = scalar_lea.vmem %s1774_s27, 2048  ;;  %p1776_p7 = scmp.lt.s32.totalorder %s2020_s15, %s1774_s27 }
  0x44   : > { %p1771_p9 = pnand %p1769_p0, %p1755_p12  ;;  %p1777_p13 = scmp.lt.s32.totalorder %s1775_s6, %s1768_s17 }
  0x46   : > { %p1772_p3 = pneg %p1771_p9  ;;  %p1778_p2 = por %p1777_p13, %p1776_p7 }
  0x48   : > { %p1779_p6 = pnand %p1778_p2, %p1772_p3 }
  0x4a   : > { %1782 = shalt.err (!%p1779_p6)
}
  0x4b   : > { %s1873_s8 = smov 128   ;;  %s1874_s16 = smov 8  }
  0x4c   : > { %1657 = dma.hbm_to_vmem [thread:$0]  (!%p2585_p8), %s2013_s7, 1024, %s2020_s15, %s2022_s29, %s1873_s8, %s1873_s8, %s1874_s16  }
  0x4d   : > { %p2586_p12 = scmp.ne.s32.totalorder %s2580_s23, 0 }
  0x4e   : > { %s2053_s19 = sand.u32 (!%p2586_p12), 1, %s1853_s10   ;;  %p2587_p4 = scmp.ne.s32.totalorder (!%p2586_p12), %s2577_s20, 0 }
  0x4f   : > { %162 = sbr.rel (%p2586_p12) target bundleno = 952 (0x3b8), region = 28  ;;  %s1621_s24 = sshll.u32 (!%p2586_p12), %s2053_s19, 6 }
  0x50   : > { %s165_s3 = scalar_lea.sflag (!%p2586_p12), [#allocation3], %s2053_s19  ;;  %s168_s4 = scalar_lea.vmem (!%p2586_p12), [#allocation2], %s1621_s24 }
  0x56   : > { %1836 = dma.done.wait (%p2587_p4), %s165_s3, 1024  }
  0x57   : > { %1838 = vsyncadd (%p2587_p4), %s165_s3, 4294966272  ;;  %p2588_p5 = scmp.ne.s32.totalorder %s2575_s18, 0 }
  0x59   : > { %1840 = dma.done.wait (%p2588_p5), [#allocation6], 64  }
  0x5a   : > { %1842 = vsyncadd (%p2588_p5), [#allocation6], 4294967232  ;;  %v2065_v0 = vld [vmem:[%s168_s4 + $0x20] sm:$0xff]  ;;  %s1875_s23 = smov 124   ;;  %v2071_v2 = vld [vmem:[%s168_s4 + $0x30] sm:$0xff]  ;;  %s1876_s20 = smov 120   ;;  %v288_v14 = vlaneseq }
  0x5b   : > { %v2067_v1 = vld [vmem:[%s168_s4] sm:$0xff]  ;;  %219 = vrot.lane.b32.xlu1 %v2065_v0, %s1875_s23  ;;  %v2073_v3 = vld [vmem:[%s168_s4 + $0x10] sm:$0xff]  ;;  %s1877_s18 = smov 116   ;;  %v2085_v4 = vld [vmem:[%s168_s4 + $0x18] sm:$0xff]  ;;  %v1878_v12 = vmov 1983009808  }
  0x5c   : > { %211 = vrot.lane.b32.xlu0 %v2067_v1, %s1875_s23  ;;  %v2087_v5 = vld [vmem:[%s168_s4 + $0x8] sm:$0xff]  ;;  %v2091_v6 = vld [vmem:[%s168_s4 + $0x38] sm:$0xff]  ;;  %v286_v13 = vunpack.c.l.s4 %v1878_v12  ;;  %v1879_v15 = vmov 1934713408   ;;  %v2110_v20 = vshrl.u32 %v288_v14, 7  ;;  %vm827_vm0 = vcmask 27648  }
  0x5d   : > { %v2093_v7 = vld [vmem:[%s168_s4 + $0x28] sm:$0xff]  ;;  %v318_v16 = vunpack.c.l.s4 %v1879_v15  ;;  %vm1054_vm1 = vcmask 1041409   ;;  %vm1056_vm2 = vcmask 1042434   ;;  %vm1058_vm3 = vcmask 1043459   ;;  %s1623_s26 = sshll.u32 %s2053_s19, 4  ;;  %s1633_s29 = sshll.u32 %s1861_s12, 8 }
  0x5e   : > { %v287_v19 = vunpack.c.0.s8 %v286_v13  ;;  %vm1409_vm4 = vcmask 1043456   ;;  %vm1404_vm5 = vcmask 31744   ;;  %s192_s7 = scalar_lea.vmem [#allocation7], %s1623_s26  ;;  %vm1494_vm6 = vcmask 60416   ;;  %s2517_s30 = scalar_lea.hbm %s2568_s2, %s1633_s29 }
  0x5f   : > { %223 = vrot.lane.b32.xlu1 %v2071_v2, %s1875_s23  ;;  %v319_v21 = vunpack.c.0.s8 %v318_v16  ;;  %s1515_s15 = sshll.u32 %s192_s7, 4  ;;  %s1500_s27 = scalar_lea.sflag [#allocation4], %s2053_s19  ;;  %s2512_s15 = int_to_ptr.vmem [resolvable:$true] %s1515_s15 }
  0x60   : > { %215 = vrot.lane.b32.xlu0 %v2073_v3, %s1875_s23  ;;  %v2113_v24 = vsub.s32 %v287_v19, %v2110_v20  ;;  %s1783_s12 = scalar_lea.vmem %s2512_s15, 256  ;;  %p2589_p10 = scmp.ne.s32.totalorder %s2578_s21, 0 }
  0x61   : > { %v2120_v29 = vsub.s32 %v319_v21, %v2110_v20  ;;  %p1784_p8 = scmp.ne.s32.totalorder %s2512_s15, %s1783_s12  ;;  %s1881_s6 = smov [#allocation7]  }
  0x62   : > { %s1787_s8 = sshll.u32 %s1881_s6, 4  ;;  %s1788_s8 = int_to_ptr.vmem [resolvable:$false] %s1787_s8 }
  0x63   : > { %239 = vrot.lane.b32.xlu1 %v2073_v3, %s1876_s20  ;;  %p1785_p11 = pnand %p1784_p8, %p2589_p10  ;;  %s1789_s16 = scalar_lea.vmem %s1788_s8, 512 }
  0x64   : > { %235 = vrot.lane.b32.xlu0 %v2067_v1, %s1876_s20  ;;  %p1790_p0 = scmp.lt.s32.totalorder %s2512_s15, %s1788_s8  ;;  %p1791_p9 = scmp.lt.s32.totalorder %s1789_s16, %s1783_s12 }
  0x65   : > { %p1786_p1 = pneg %p1785_p11 }
  0x66   : > { %p1792_p3 = por %p1791_p9, %p1790_p0 }
  0x67   : > { %247 = vrot.lane.b32.xlu1 %v2071_v2, %s1876_s20 }
  0x68   : > { %243 = vrot.lane.b32.xlu0 %v2065_v0, %s1876_s20  ;;  %p1793_p7 = pnand %p1792_p3, %p1786_p1 }
  0x6b   : > { %263 = vrot.lane.b32.xlu1 %v2073_v3, %s1877_s18 }
  0x6c   : > { %259 = vrot.lane.b32.xlu0 %v2067_v1, %s1877_s18 }
  0x6f   : > { %271 = vrot.lane.b32.xlu1 %v2071_v2, %s1877_s18 }
  0x70   : > { %267 = vrot.lane.b32.xlu0 %v2065_v0, %s1877_s18 }
  0x73   : > { %217 = vrot.lane.b32.xlu1 %v2085_v4, %s1875_s23 }
  0x74   : > { %213 = vrot.lane.b32.xlu0 %v2087_v5, %s1875_s23 }
  0x77   : > { %225 = vrot.lane.b32.xlu1 %v2091_v6, %s1875_s23 }
  0x78   : > { %221 = vrot.lane.b32.xlu0 %v2093_v7, %s1875_s23 }
  0x7b   : > { %241 = vrot.lane.b32.xlu1 %v2085_v4, %s1876_s20 }
  0x7c   : > { %237 = vrot.lane.b32.xlu0 %v2087_v5, %s1876_s20 }
  0x7f   : > { %249 = vrot.lane.b32.xlu1 %v2091_v6, %s1876_s20 }
  0x80   : > { %245 = vrot.lane.b32.xlu0 %v2093_v7, %s1876_s20 }
  0x83   : > { %265 = vrot.lane.b32.xlu1 %v2085_v4, %s1877_s18 }
  0x84   : > { %261 = vrot.lane.b32.xlu0 %v2087_v5, %s1877_s18 }
  0x87   : > { %273 = vrot.lane.b32.xlu1 %v2091_v6, %s1877_s18 }
  0x88   : > { %269 = vrot.lane.b32.xlu0 %v2093_v7, %s1877_s18 }
  0xcd   : > { %v2105_v8 = vpop.permute.xlu1 %219 }
  0xce   : > { %v212_v9 = vpop.permute.xlu0 %211 }
  0xd1   : > { %v2107_v10 = vpop.permute.xlu1 %223 }
  0xd2   : > { %v216_v11 = vpop.permute.xlu0 %215 }
  0xd5   : > { %v240_v17 = vpop.permute.xlu1 %239 }
  0xd6   : > { %v236_v18 = vpop.permute.xlu0 %235  ;;  %v419_v25 = vcombine.low %v2073_v3, %v240_v17  ;;  %v420_v26 = vcombine.high %v2073_v3, %v240_v17 }
  0xd7   : > { %v283_v27 = vcombine.low %v2067_v1, %v236_v18  ;;  %v284_v28 = vcombine.high %v2067_v1, %v236_v18  ;;  %v1880_v18 = vmov 0.0  }
  0xd8   : > { %v2127_v40 = vrot.slane %v419_v25, %v2113_v24  ;;  %v2130_v41 = vrot.slane %v420_v26, %v2113_v24 }
  0xd9   : > { %v248_v22 = vpop.permute.xlu1 %247  ;;  %v291_v46 = vrot.slane %v283_v27, %v2113_v24  ;;  %v298_v47 = vrot.slane %v284_v28, %v2113_v24 }
  0xda   : > { %v244_v23 = vpop.permute.xlu0 %243  ;;  %v691_v30 = vcombine.low %v2071_v2, %v248_v22  ;;  %v692_v31 = vcombine.high %v2071_v2, %v248_v22 }
  0xdb   : > { %v555_v32 = vcombine.low %v2065_v0, %v244_v23  ;;  %v556_v33 = vcombine.high %v2065_v0, %v244_v23 }
  0xdc   : > { %v2143_v48 = vrot.slane %v691_v30, %v2113_v24  ;;  %v2146_v49 = vrot.slane %v692_v31, %v2113_v24 }
  0xdd   : > { %v264_v34 = vpop.permute.xlu1 %263  ;;  %v2149_v52 = vrot.slane %v555_v32, %v2113_v24  ;;  %v2152_v53 = vrot.slane %v556_v33, %v2113_v24 }
  0xde   : > { %v260_v35 = vpop.permute.xlu0 %259  ;;  %v435_v36 = vcombine.low %v216_v11, %v264_v34  ;;  %v436_v37 = vcombine.high %v216_v11, %v264_v34 }
  0xdf   : > { %v299_v38 = vcombine.low %v212_v9, %v260_v35  ;;  %v300_v39 = vcombine.high %v212_v9, %v260_v35 }
  0xe0   : > { %v2133_v42 = vrot.slane %v435_v36, %v2113_v24  ;;  %v2136_v43 = vrot.slane %v436_v37, %v2113_v24 }
  0xe1   : > { %v307_v44 = vrot.slane %v299_v38, %v2113_v24  ;;  %v314_v45 = vrot.slane %v300_v39, %v2113_v24  ;;  %v272_v50 = vpop.permute.xlu1 %271 }
  0xe2   : > { %v268_v51 = vpop.permute.xlu0 %267  ;;  %v451_v54 = vcombine.low %v2127_v40, %v2133_v42  ;;  %v467_v55 = vcombine.low %v2130_v41, %v2136_v43  ;;  %v452_v56 = vcombine.high %v2127_v40, %v2133_v42  ;;  %v468_v60 = vcombine.high %v2130_v41, %v2136_v43 }
  0xe3   : > { %v315_v57 = vcombine.low %v291_v46, %v307_v44  ;;  %v331_v58 = vcombine.low %v298_v47, %v314_v45  ;;  %v332_v59 = vcombine.high %v298_v47, %v314_v45  ;;  %v316_v61 = vcombine.high %v291_v46, %v307_v44 }
  0xe4   : > { %v707_v62 = vcombine.low %v2107_v10, %v272_v50  ;;  %v708_v63 = vcombine.high %v2107_v10, %v272_v50  ;;  %v459_v0 = vrot.slane %v451_v54, %v2120_v29  ;;  %v571_v2 = vcombine.low %v2105_v8, %v268_v51 }
  0xe5   : > { %v339_v1 = vrot.slane %v331_v58, %v2120_v29  ;;  %v572_v3 = vcombine.high %v2105_v8, %v268_v51  ;;  %v2168_v9 = vpop.permute.xlu1 %217  ;;  %v2173_v12 = vrot.slane %v467_v55, %v2120_v29  ;;  %v346_v15 = vrot.slane %v332_v59, %v2120_v29 }
  0xe6   : > { %v2170_v11 = vpop.permute.xlu0 %213  ;;  %v2176_v13 = vrot.slane %v707_v62, %v2113_v24  ;;  %v2179_v10 = vrot.slane %v708_v63, %v2113_v24  ;;  %v323_v16 = vrot.slane %v315_v57, %v2120_v29  ;;  %v579_v17 = vrot.slane %v571_v2, %v2113_v24 }
  0xe7   : > { %v2185_v8 = vrot.slane %v572_v3, %v2113_v24  ;;  %v349_v19 = vcombine.high %v339_v1, %v1880_v18  ;;  %v837_v23 = vsel %vm827_vm0, %v339_v1, 0.0  ;;  %v330_v25 = vrot.slane %v316_v61, %v2120_v29 }
  0xe8   : > { %v723_v21 = vcombine.low %v2143_v48, %v2176_v13  ;;  %v739_v22 = vcombine.low %v2146_v49, %v2179_v10  ;;  %v724_v26 = vcombine.high %v2143_v48, %v2176_v13  ;;  %v740_v27 = vcombine.high %v2146_v49, %v2179_v10 }
  0xe9   : > { %v587_v28 = vcombine.low %v2149_v52, %v579_v17  ;;  %v603_v30 = vcombine.low %v2152_v53, %v2185_v8  ;;  %v2201_v31 = vpop.permute.xlu1 %225  ;;  %v588_v33 = vcombine.high %v2149_v52, %v579_v17  ;;  %v604_v34 = vcombine.high %v2152_v53, %v2185_v8 }
  0xea   : > { %v2203_v32 = vpop.permute.xlu0 %221  ;;  %v350_v35 = vcombine.high %v346_v15, %v1880_v18  ;;  %v838_v36 = vsel %vm827_vm0, %v349_v19, 0.0  ;;  %v2211_v37 = vrot.slane %v723_v21, %v2120_v29  ;;  %v2214_v38 = vrot.slane %v739_v22, %v2120_v29 }
  0xeb   : > { %v595_v39 = vrot.slane %v587_v28, %v2120_v29  ;;  %v839_v40 = vadd.f32 %v838_v36, %v837_v23  ;;  %v2218_v42 = vrot.slane %v603_v30, %v2120_v29  ;;  %v840_v44 = vsel %vm827_vm0, %v346_v15, 0.0 }
  0xec   : > { %v347_v45 = vcombine.high %v323_v16, %v1880_v18  ;;  %v348_v46 = vcombine.high %v330_v25, %v1880_v18  ;;  %v842_v52 = vsel %vm827_vm0, %v350_v35, 0.0  ;;  %v466_v54 = vrot.slane %v452_v56, %v2120_v29 }
  0xed   : > { %v242_v47 = vpop.permute.xlu1 %241  ;;  %v841_v51 = vadd.f32 %v840_v44, %v839_v40  ;;  %v483_v55 = vcombine.high %v459_v0, %v1880_v18  ;;  %v828_v61 = vsel %vm827_vm0, %v323_v16, 0.0  ;;  %v831_v2 = vsel %vm827_vm0, %v330_v25, 0.0 }
  0xee   : > { %v238_v50 = vpop.permute.xlu0 %237  ;;  %v487_v57 = vcombine.low %v2085_v4, %v242_v47  ;;  %v488_v58 = vcombine.high %v2085_v4, %v242_v47  ;;  %v829_v1 = vsel %vm827_vm0, %v347_v45, 0.0  ;;  %v833_v15 = vsel %vm827_vm0, %v348_v46, 0.0 }
  0xef   : > { %v351_v59 = vcombine.low %v2087_v5, %v238_v50  ;;  %v352_v62 = vcombine.high %v2087_v5, %v238_v50  ;;  %v843_v63 = vadd.f32 %v842_v52, %v841_v51  ;;  %v484_v4 = vcombine.high %v466_v54, %v1880_v18 }
  0xf0   : > { %v2234_v3 = vrot.slane %v487_v57, %v2113_v24  ;;  %v2237_v56 = vrot.slane %v488_v58, %v2113_v24  ;;  %v830_v5 = vadd.f32 %v829_v1, %v828_v61  ;;  %v864_v21 = vsel %vm827_vm0, %v459_v0, 0.0 }
  0xf1   : > { %v2242_v17 = vrot.slane %v351_v59, %v2113_v24  ;;  %844 = vadd.xlane.f32.xlu1 %v843_v63  ;;  %v250_v16 = vpop.permute.xlu1 %249  ;;  %v865_v22 = vsel %vm827_vm0, %v483_v55, 0.0  ;;  %v2251_v35 = vrot.slane %v352_v62, %v2113_v24  ;;  %v602_v44 = vrot.slane %v588_v33, %v2120_v29 }
  0xf2   : > { %v246_v19 = vpop.permute.xlu0 %245  ;;  %v759_v23 = vcombine.low %v2091_v6, %v250_v16  ;;  %v760_v25 = vcombine.high %v2091_v6, %v250_v16  ;;  %v832_v36 = vadd.f32 %v831_v2, %v830_v5  ;;  %v866_v40 = vadd.f32 %v865_v22, %v864_v21 }
  0xf3   : > { %v623_v28 = vcombine.low %v2093_v7, %v246_v19  ;;  %v624_v30 = vcombine.high %v2093_v7, %v246_v19  ;;  %v867_v46 = vsel %vm827_vm0, %v466_v54, 0.0  ;;  %v869_v6 = vsel %vm827_vm0, %v484_v4, 0.0 }
  0xf4   : > { %v2255_v45 = vrot.slane %v759_v23, %v2113_v24  ;;  %v2258_v0 = vrot.slane %v760_v25, %v2113_v24  ;;  %v834_v47 = vadd.f32 %v833_v15, %v832_v36  ;;  %v868_v50 = vadd.f32 %v867_v46, %v866_v40 }
  0xf5   : > { %v2263_v7 = vrot.slane %v623_v28, %v2113_v24  ;;  %v619_v51 = vcombine.high %v595_v39, %v1880_v18  ;;  %v266_v52 = vpop.permute.xlu1 %265  ;;  %v2267_v33 = vrot.slane %v624_v30, %v2113_v24  ;;  %v620_v57 = vcombine.high %v602_v44, %v1880_v18 }
  0xf6   : > { %v262_v55 = vpop.permute.xlu0 %261  ;;  %v503_v58 = vcombine.low %v2168_v9, %v266_v52  ;;  %v504_v54 = vcombine.high %v2168_v9, %v266_v52  ;;  %835 = vadd.xlane.f32.xlu0 %v834_v47  ;;  %v900_v59 = vsel %vm827_vm0, %v595_v39, 0.0  ;;  %v903_v62 = vsel %vm827_vm0, %v602_v44, 0.0 }
  0xf7   : > { %v901_v61 = vsel %vm827_vm0, %v619_v51, 0.0  ;;  %v367_v63 = vcombine.low %v2170_v11, %v262_v55  ;;  %v368_v4 = vcombine.high %v2170_v11, %v262_v55  ;;  %v870_v5 = vadd.f32 %v869_v6, %v868_v50 }
  0xf8   : > { %v902_v1 = vadd.f32 %v901_v61, %v900_v59  ;;  %v2277_v2 = vrot.slane %v503_v58, %v2113_v24  ;;  %v2280_v15 = vrot.slane %v504_v54, %v2113_v24  ;;  %v482_v39 = vrot.slane %v468_v60, %v2120_v29 }
  0xf9   : > { %v2284_v9 = vrot.slane %v367_v63, %v2113_v24  ;;  %v485_v16 = vcombine.high %v2173_v12, %v1880_v18  ;;  %v905_v21 = vsel %vm827_vm0, %v620_v57, 0.0  ;;  %v2300_v25 = vrot.slane %v368_v4, %v2113_v24  ;;  %v274_v40 = vpop.permute.xlu1 %273 }
  0xfa   : > { %v904_v19 = vadd.f32 %v903_v62, %v902_v1  ;;  %v519_v22 = vcombine.low %v2234_v3, %v2277_v2  ;;  %v535_v11 = vcombine.low %v2237_v56, %v2280_v15  ;;  %871 = vadd.xlane.f32.xlu0 %v870_v5  ;;  %v520_v23 = vcombine.high %v2234_v3, %v2277_v2  ;;  %v270_v55 = vpop.permute.xlu0 %269 }
  0xfb   : > { %v383_v41 = vcombine.low %v2242_v17, %v2284_v9  ;;  %v873_v43 = vsel %vm827_vm0, %v2173_v12, 0.0  ;;  %v536_v28 = vcombine.high %v2237_v56, %v2280_v15  ;;  %v384_v30 = vcombine.high %v2242_v17, %v2284_v9 }
  0xfc   : > { %v906_v60 = vadd.f32 %v905_v21, %v904_v19  ;;  %v486_v36 = vcombine.high %v482_v39, %v1880_v18  ;;  %v2312_v44 = vrot.slane %v519_v22, %v2120_v29  ;;  %v2315_v46 = vrot.slane %v535_v11, %v2120_v29 }
  0xfd   : > { %v2318_v6 = vrot.slane %v383_v41, %v2120_v29  ;;  %v874_v12 = vsel %vm827_vm0, %v485_v16, 0.0  ;;  %v399_v47 = vcombine.low %v2251_v35, %v2300_v25  ;;  %v400_v50 = vcombine.high %v2251_v35, %v2300_v25 }
  0xfe   : > { %907 = vadd.xlane.f32.xlu1 %v906_v60  ;;  %v875_v51 = vadd.f32 %v874_v12, %v873_v43  ;;  %v738_v52 = vrot.slane %v724_v26, %v2120_v29  ;;  %v876_v57 = vsel %vm827_vm0, %v482_v39, 0.0  ;;  %v878_v58 = vsel %vm827_vm0, %v486_v36, 0.0 }
  0xff   : > { %v755_v54 = vcombine.high %v2211_v37, %v1880_v18  ;;  %v775_v59 = vcombine.low %v2201_v31, %v274_v40  ;;  %v936_v63 = vsel %vm827_vm0, %v2211_v37, 0.0  ;;  %v776_v1 = vcombine.high %v2201_v31, %v274_v40 }
 0x100   : > { %v877_v61 = vadd.f32 %v876_v57, %v875_v51  ;;  %v756_v62 = vcombine.high %v738_v52, %v1880_v18  ;;  %v639_v26 = vcombine.low %v2203_v32, %v270_v55  ;;  %v640_v4 = vcombine.high %v2203_v32, %v270_v55 }
 0x101   : > { %v937_v48 = vsel %vm827_vm0, %v755_v54, 0.0  ;;  %v783_v13 = vrot.slane %v775_v59, %v2113_v24  ;;  %v2343_v5 = vrot.slane %v399_v47, %v2120_v29  ;;  %v2346_v19 = vrot.slane %v776_v1, %v2113_v24 }
 0x102   : > { %v879_v39 = vadd.f32 %v878_v58, %v877_v61  ;;  %v938_v16 = vadd.f32 %v937_v48, %v936_v63  ;;  %v939_v37 = vsel %vm827_vm0, %v738_v52, 0.0  ;;  %v647_v21 = vrot.slane %v639_v26, %v2113_v24 }
 0x103   : > { %v791_v31 = vcombine.low %v2255_v45, %v783_v13  ;;  %v2352_v22 = vrot.slane %v640_v4, %v2113_v24  ;;  %v941_v32 = vsel %vm827_vm0, %v756_v62, 0.0  ;;  %v807_v41 = vcombine.low %v2258_v0, %v2346_v19 }
 0x104   : > { %880 = vadd.xlane.f32.xlu0 %v879_v39  ;;  %v940_v11 = vadd.f32 %v939_v37, %v938_v16  ;;  %v618_v43 = vrot.slane %v604_v34, %v2120_v29  ;;  %v792_v60 = vcombine.high %v2255_v45, %v783_v13  ;;  %v808_v36 = vcombine.high %v2258_v0, %v2346_v19 }
 0x105   : > { %v655_v40 = vcombine.low %v2263_v7, %v647_v21  ;;  %v671_v12 = vcombine.low %v2267_v33, %v2352_v22  ;;  %v799_v51 = vrot.slane %v791_v31, %v2120_v29  ;;  %v656_v52 = vcombine.high %v2263_v7, %v647_v21 }
 0x106   : > { %v942_v47 = vadd.f32 %v941_v32, %v940_v11  ;;  %v621_v55 = vcombine.high %v2218_v42, %v1880_v18  ;;  %v2372_v53 = vrot.slane %v807_v41, %v2120_v29  ;;  %v672_v34 = vcombine.high %v2267_v33, %v2352_v22 }
 0x107   : > { %v663_v8 = vrot.slane %v655_v40, %v2120_v29  ;;  %v622_v45 = vcombine.high %v618_v43, %v1880_v18  ;;  %v909_v57 = vsel %vm827_vm0, %v2218_v42, 0.0  ;;  %v754_v7 = vrot.slane %v740_v27, %v2120_v29 }
 0x108   : > { %943 = vadd.xlane.f32.xlu1 %v942_v47  ;;  %v910_v58 = vsel %vm827_vm0, %v621_v55, 0.0  ;;  %v757_v54 = vcombine.high %v2214_v38, %v1880_v18  ;;  %v2388_v59 = vrot.slane %v671_v12, %v2120_v29  ;;  %v912_v62 = vsel %vm827_vm0, %v618_v43, 0.0 }
 0x109   : > { %v911_v61 = vadd.f32 %v910_v58, %v909_v57  ;;  %v534_v42 = vrot.slane %v520_v23, %v2120_v29  ;;  %v758_v63 = vcombine.high %v754_v7, %v1880_v18  ;;  %v945_v49 = vsel %vm827_vm0, %v2214_v38, 0.0 }
 0x10a   : > { %v946_v10 = vsel %vm827_vm0, %v757_v54, 0.0  ;;  %v551_v27 = vcombine.high %v2312_v44, %v1880_v18  ;;  %v914_v48 = vsel %vm827_vm0, %v622_v45, 0.0  ;;  %v948_v4 = vsel %vm827_vm0, %v754_v7, 0.0 }
 0x10b   : > { %v913_v1 = vadd.f32 %v912_v62, %v911_v61  ;;  %v947_v13 = vadd.f32 %v946_v10, %v945_v49  ;;  %v552_v26 = vcombine.high %v534_v42, %v1880_v18  ;;  %v882_v3 = vsel %vm827_vm0, %v2312_v44, 0.0 }
 0x10c   : > { %v883_v2 = vsel %vm827_vm0, %v551_v27, 0.0  ;;  %v398_v38 = vrot.slane %v384_v30, %v2120_v29  ;;  %v950_v16 = vsel %vm827_vm0, %v758_v63, 0.0  ;;  %v885_v31 = vsel %vm827_vm0, %v534_v42, 0.0 }
 0x10d   : > { %v915_v23 = vadd.f32 %v914_v48, %v913_v1  ;;  %v949_v39 = vadd.f32 %v948_v4, %v947_v13  ;;  %v884_v37 = vadd.f32 %v883_v2, %v882_v3  ;;  %v887_v21 = vsel %vm827_vm0, %v552_v26, 0.0 }
 0x10e   : > { %v415_v11 = vcombine.high %v2318_v6, %v1880_v18  ;;  %v416_v44 = vcombine.high %v398_v38, %v1880_v18  ;;  %v846_v17 = vsel %vm827_vm0, %v2318_v6, 0.0  ;;  %v806_v9 = vrot.slane %v792_v60, %v2120_v29 }
 0x10f   : > { %916 = vadd.xlane.f32.xlu0 %v915_v23  ;;  %v886_v32 = vadd.f32 %v885_v31, %v884_v37  ;;  %v823_v30 = vcombine.high %v799_v51, %v1880_v18  ;;  %v951_v41 = vadd.f32 %v950_v16, %v949_v39  ;;  %v849_v40 = vsel %vm827_vm0, %v398_v38, 0.0 }
 0x110   : > { %v847_v43 = vsel %vm827_vm0, %v415_v11, 0.0  ;;  %v670_v12 = vrot.slane %v656_v52, %v2120_v29  ;;  %v824_v55 = vcombine.high %v806_v9, %v1880_v18  ;;  %v954_v45 = vsel %vm827_vm0, %v799_v51, 0.0 }
 0x111   : > { %v848_v47 = vadd.f32 %v847_v43, %v846_v17  ;;  %v955_v57 = vsel %vm827_vm0, %v823_v30, 0.0  ;;  %v851_v6 = vsel %vm827_vm0, %v416_v44, 0.0  ;;  %v687_v60 = vcombine.high %v663_v8, %v1880_v18 }
 0x112   : > { %v956_v58 = vadd.f32 %v955_v57, %v954_v45  ;;  %v688_v7 = vcombine.high %v670_v12, %v1880_v18  ;;  %v888_v54 = vadd.f32 %v887_v21, %v886_v32  ;;  %v957_v62 = vsel %vm827_vm0, %v806_v9, 0.0 }
 0x113   : > { %952 = vadd.xlane.f32.xlu0 %v951_v41  ;;  %v850_v61 = vadd.f32 %v849_v40, %v848_v47  ;;  %v959_v52 = vsel %vm827_vm0, %v824_v55, 0.0  ;;  %v918_v63 = vsel %vm827_vm0, %v663_v8, 0.0  ;;  %v919_v51 = vsel %vm827_vm0, %v687_v60, 0.0 }
 0x114   : > { %v958_v42 = vadd.f32 %v957_v62, %v956_v58  ;;  %v550_v49 = vrot.slane %v536_v28, %v2120_v29  ;;  %v920_v27 = vadd.f32 %v919_v51, %v918_v63  ;;  %v921_v1 = vsel %vm827_vm0, %v670_v12, 0.0 }
 0x115   : > { %v852_v10 = vadd.f32 %v851_v6, %v850_v61  ;;  %v553_v48 = vcombine.high %v2315_v46, %v1880_v18  ;;  %v923_v13 = vsel %vm827_vm0, %v688_v7, 0.0  ;;  %v891_v8 = vsel %vm827_vm0, %v2315_v46, 0.0 }
 0x116   : > { %v554_v26 = vcombine.high %v550_v49, %v1880_v18  ;;  %v414_v56 = vrot.slane %v400_v50, %v2120_v29  ;;  %v960_v15 = vadd.f32 %v959_v52, %v958_v42  ;;  %v922_v28 = vadd.f32 %v921_v1, %v920_v27 }
 0x117   : > { %889 = vadd.xlane.f32.xlu0 %v888_v54  ;;  %853 = vadd.xlane.f32.xlu1 %v852_v10  ;;  %v892_v4 = vsel %vm827_vm0, %v553_v48, 0.0  ;;  %v417_v3 = vcombine.high %v2343_v5, %v1880_v18  ;;  %v894_v38 = vsel %vm827_vm0, %v550_v49, 0.0  ;;  %v855_v46 = vsel %vm827_vm0, %v2343_v5, 0.0 }
 0x118   : > { %v893_v2 = vadd.f32 %v892_v4, %v891_v8  ;;  %v418_v23 = vcombine.high %v414_v56, %v1880_v18  ;;  %v924_v39 = vadd.f32 %v923_v13, %v922_v28  ;;  %v822_v25 = vrot.slane %v808_v36, %v2120_v29 }
 0x119   : > { %v856_v35 = vsel %vm827_vm0, %v417_v3, 0.0  ;;  %v825_v50 = vcombine.high %v2372_v53, %v1880_v18  ;;  %v896_v37 = vsel %vm827_vm0, %v554_v26, 0.0  ;;  %v858_v21 = vsel %vm827_vm0, %v414_v56, 0.0 }
 0x11a   : > { %v895_v16 = vadd.f32 %v894_v38, %v893_v2  ;;  %v857_v31 = vadd.f32 %v856_v35, %v855_v46  ;;  %v963_v5 = vsel %vm827_vm0, %v2372_v53, 0.0  ;;  %v686_v0 = vrot.slane %v672_v34, %v2120_v29 }
 0x11b   : > { %961 = vadd.xlane.f32.xlu0 %v960_v15  ;;  %925 = vadd.xlane.f32.xlu1 %v924_v39  ;;  %v964_v11 = vsel %vm827_vm0, %v825_v50, 0.0  ;;  %v826_v36 = vcombine.high %v822_v25, %v1880_v18  ;;  %v689_v32 = vcombine.high %v2388_v59, %v1880_v18  ;;  %v860_v9 = vsel %vm827_vm0, %v418_v23, 0.0 }
 0x11c   : > { %v859_v19 = vadd.f32 %v858_v21, %v857_v31  ;;  %v965_v44 = vadd.f32 %v964_v11, %v963_v5  ;;  %v897_v17 = vadd.f32 %v896_v37, %v895_v16  ;;  %v966_v30 = vsel %vm827_vm0, %v822_v25, 0.0 }
 0x11d   : > { %v690_v53 = vcombine.high %v686_v0, %v1880_v18  ;;  %v927_v33 = vsel %vm827_vm0, %v2388_v59, 0.0  ;;  %v928_v22 = vsel %vm827_vm0, %v689_v32, 0.0  ;;  %v968_v40 = vsel %vm827_vm0, %v826_v36, 0.0 }
 0x11e   : > { %v861_v41 = vadd.f32 %v860_v9, %v859_v19  ;;  %v967_v43 = vadd.f32 %v966_v30, %v965_v44  ;;  %v929_v34 = vadd.f32 %v928_v22, %v927_v33  ;;  %v930_v12 = vsel %vm827_vm0, %v686_v0, 0.0 }
 0x11f   : > { %898 = vadd.xlane.f32.xlu0 %v897_v17  ;;  %v932_v45 = vsel %vm827_vm0, %v690_v53, 0.0  ;;  %v989_v52 = vand.u32 127, %v288_v14 }
 0x120   : > { %862 = vadd.xlane.f32.xlu1 %v861_v41  ;;  %v969_v47 = vadd.f32 %v968_v40, %v967_v43  ;;  %v931_v55 = vadd.f32 %v930_v12, %v929_v34 }
 0x121   : > { %v992_v51 = vsub.s32 %v989_v52, %v2110_v20 }
 0x122   : > { %v933_v57 = vadd.f32 %v932_v45, %v931_v55 }
 0x123   : > { %970 = vadd.xlane.f32.xlu0 %v969_v47 }
 0x124   : > { %934 = vadd.xlane.f32.xlu1 %v933_v57  ;;  %v1397_v57 = vld [vmem:[#allocation5] sm:$0xf] }
 0x125   : > { %1637 = vmatprep.subr.msk.mxu0 %vm1409_vm4, %v1397_v57 }
 0x126   : > { %1638 = vmatpush3.msk.msra.mxu0 %vm1409_vm4, %v1397_v57 }
 0x17e   : > { %v845_v60 = vpop.xlane.xlu1 %844 }
 0x17f   : > { %v997_v1 = vrot.slane %v845_v60, %v992_v51 }
 0x183   : > { %v836_v6 = vpop.xlane.xlu0 %835 }
 0x184   : > { %v993_v48 = vrot.slane %v836_v6, %v992_v51 }
 0x186   : > { %v1055_v20 = vsel %vm1054_vm1, %v997_v1, %v993_v48 }
 0x187   : > { %v872_v58 = vpop.xlane.xlu0 %871 }
 0x188   : > { %v1009_v26 = vrot.slane %v872_v58, %v992_v51 }
 0x18b   : > { %v908_v7 = vpop.xlane.xlu1 %907 }
 0x18c   : > { %v1025_v37 = vrot.slane %v908_v7, %v992_v51 }
 0x191   : > { %v881_v59 = vpop.xlane.xlu0 %880 }
 0x192   : > { %v1013_v27 = vrot.slane %v881_v59, %v992_v51 }
 0x194   : > { %v1060_v14 = vsel %vm1054_vm1, %v1013_v27, %v1009_v26 }
 0x195   : > { %v944_v61 = vpop.xlane.xlu1 %943 }
 0x196   : > { %v1041_v23 = vrot.slane %v944_v61, %v992_v51 }
 0x19c   : > { %v917_v54 = vpop.xlane.xlu0 %916 }
 0x19d   : > { %v1029_v46 = vrot.slane %v917_v54, %v992_v51 }
 0x19f   : > { %v1063_v19 = vsel %vm1054_vm1, %v1029_v46, %v1025_v37 }
 0x1a0   : > { %v953_v62 = vpop.xlane.xlu0 %952 }
 0x1a1   : > { %v1045_v15 = vrot.slane %v953_v62, %v992_v51 }
 0x1a3   : > { %v1066_v21 = vsel %vm1054_vm1, %v1045_v15, %v1041_v23 }
 0x1a4   : > { %v854_v42 = vpop.xlane.xlu1 %853  ;;  %v890_v63 = vpop.xlane.xlu0 %889 }
 0x1a5   : > { %v1017_v13 = vrot.slane %v890_v63, %v992_v51  ;;  %v1001_v8 = vrot.slane %v854_v42, %v992_v51 }
 0x1a7   : > { %v1061_v38 = vsel %vm1056_vm2, %v1017_v13, %v1060_v14  ;;  %v1057_v39 = vsel %vm1056_vm2, %v1001_v8, %v1055_v20 }
 0x1a8   : > { %v926_v49 = vpop.xlane.xlu1 %925  ;;  %v962_v10 = vpop.xlane.xlu0 %961 }
 0x1a9   : > { %v1049_v3 = vrot.slane %v962_v10, %v992_v51  ;;  %v1033_v25 = vrot.slane %v926_v49, %v992_v51 }
 0x1ab   : > { %v1067_v11 = vsel %vm1056_vm2, %v1049_v3, %v1066_v21  ;;  %v1064_v44 = vsel %vm1056_vm2, %v1033_v25, %v1063_v19 }
 0x1ac   : > { %v899_v56 = vpop.xlane.xlu0 %898 }
 0x1ad   : > { %v863_v28 = vpop.xlane.xlu1 %862  ;;  %v1021_v4 = vrot.slane %v899_v56, %v992_v51 }
 0x1ae   : > { %v1005_v2 = vrot.slane %v863_v28, %v992_v51 }
 0x1af   : > { %v1062_v35 = vsel %vm1058_vm3, %v1021_v4, %v1061_v38 }
 0x1b0   : > { %v1059_v50 = vsel %vm1058_vm3, %v1005_v2, %v1057_v39  ;;  %1105 = vxpose.xlu0.b32.start.end [1/1] (short) (narrow) %v1062_v35, 8  ;;  %v971_v16 = vpop.xlane.xlu0 %970 }
 0x1b1   : > { %1073 = vxpose.xlu1.b32.start.end [1/1] (short) (narrow) %v1059_v50, 8  ;;  %v1053_v31 = vrot.slane %v971_v16, %v992_v51  ;;  %v935_v5 = vpop.xlane.xlu1 %934 }
 0x1b2   : > { %v1037_v0 = vrot.slane %v935_v5, %v992_v51 }
 0x1b3   : > { %v1068_v36 = vsel %vm1058_vm3, %v1053_v31, %v1067_v11 }
 0x1b4   : > { %v1065_v32 = vsel %vm1058_vm3, %v1037_v0, %v1064_v44 }
 0x1b5   : > { %1169 = vxpose.xlu1.b32.start.end [1/1] (short) (narrow) %v1068_v36, 8  ;;  %1137 = vxpose.xlu0.b32.start.end [1/1] (short) (narrow) %v1065_v32, 8 }
 0x230   : > { %v1121_v17 = vpop.trf.xlu0 }
 0x231   : > { %v1089_v9 = vpop.trf.xlu1 }
 0x235   : > { %v1185_v30 = vpop.trf.xlu1  ;;  %v1153_v41 = vpop.trf.xlu0 }
 0x236   : > { %v1209_v53 = vcombine.low %v1121_v17, %v1185_v30  ;;  %v1201_v43 = vcombine.low %v1089_v9, %v1153_v41 }
 0x238   : > { %v1216_v33 = vrot.slane %v1209_v53, %v2113_v24  ;;  %v1208_v22 = vrot.slane %v1201_v43, %v2113_v24 }
 0x23a   : > { %v1217_v34 = vcombine.low %v1208_v22, %v1216_v33  ;;  %v1218_v40 = vcombine.high %v1208_v22, %v1216_v33 }
 0x23c   : > { %v1225_v12 = vrot.slane %v1217_v34, %v2120_v29  ;;  %v1232_v55 = vrot.slane %v1218_v40, %v2120_v29 }
 0x23e   : > { %1235 = vxpose.xlu0.b32.start.end [1/1] (short) (narrow) %v1225_v12, 8  ;;  %v1233_v47 = vcombine.high %v1225_v12, %v1880_v18  ;;  %v1234_v45 = vcombine.high %v1232_v55, %v1880_v18 }
 0x240   : > { %1267 = vxpose.xlu1.b32.start.end [1/1] (short) (narrow) %v1233_v47, 8 }
 0x242   : > { %1299 = vxpose.xlu0.b32.start.end [1/1] (short) (narrow) %v1232_v55, 8 }
 0x244   : > { %1331 = vxpose.xlu1.b32.start.end [1/1] (short) (narrow) %v1234_v45, 8 }
 0x2be   : > { %v1251_v6 = vpop.trf.xlu0 }
 0x2c0   : > { %v1283_v58 = vpop.trf.xlu1 }
 0x2c2   : > { %v1315_v60 = vpop.trf.xlu0 }
 0x2c3   : > { %v1363_v59 = vcombine.low %v1251_v6, %v1315_v60 }
 0x2c4   : > { %v1347_v7 = vpop.trf.xlu1 }
 0x2c5   : > { %v1371_v54 = vcombine.low %v1283_v58, %v1347_v7  ;;  %v1370_v61 = vrot.slane %v1363_v59, %v2113_v24 }
 0x2c7   : > { %v1378_v62 = vrot.slane %v1371_v54, %v2113_v24 }
 0x2c9   : > { %v1379_v52 = vcombine.low %v1370_v61, %v1378_v62  ;;  %v1380_v42 = vcombine.high %v1370_v61, %v1378_v62 }
 0x2cb   : > { %v1394_v63 = vrot.slane %v1380_v42, %v2120_v29  ;;  %v1387_v51 = vrot.slane %v1379_v52, %v2120_v29 }
 0x2cd   : > { %v1396_v49 = vcombine.high %v1394_v63, %v1880_v18  ;;  %v1395_v10 = vcombine.high %v1387_v51, %v1880_v18 }
 0x2cf   : > { %v1402_v27 = vcombine.low %v1387_v51, %v1395_v10  ;;  %v1403_v1 = vcombine.low %v1394_v63, %v1396_v49 }
 0x2d1   : > { %1639 = vmatprep.mubr.msk.f32.mxu0 %vm1404_vm5, %v1402_v27 }
 0x2d2   : > { %1640 = vmatmul.mubr.msk.f32.vlgmr.msra.gmra.mrb[0].mxu0 %vm1404_vm5, %v1403_v1 }
 0x3a5   : > { %v1641_v24 = vpop.f32.mrb[0].mxu0 }
 0x3a6   : > { %v1491_v29 = vcombine.high %v1641_v24, %v1641_v24  ;;  %1497 = vst.msk [vmem:[%s192_s7 + $0x8] sm:$0xf] %vm1494_vm6, %v1641_v24  ;;  %v1479_v18 = vpop.f32.mrb[1].mxu0 }
 0x3a7   : > { %v1490_v48 = vcombine.high %v1479_v18, %v1479_v18  ;;  %1495 = vst.msk [vmem:[%s192_s7] sm:$0xf] %vm1494_vm6, %v1479_v18 }
 0x3a8   : > { %1498 = vst.msk [vmem:[%s192_s7 + $0xc] sm:$0xf] %vm1494_vm6, %v1491_v29 }
 0x3a9   : > { %1496 = vst.msk [vmem:[%s192_s7 + $0x4] sm:$0xf] %vm1494_vm6, %v1490_v48 }
 0x3aa   : > { %1796 = shalt.err (!%p1793_p7)
}
 0x3ab   : > { %s1797_s24 = scalar_lea.hbm %s2517_s30, 256  ;;  %s1801_s23 = scalar_lea.hbm %s2568_s2, 512 }
 0x3ac   : > { %p1798_p13 = scmp.ne.s32.totalorder %s2517_s30, %s1797_s24  ;;  %p1802_p12 = scmp.lt.u32.totalorder %s2517_s30, %s2568_s2 }
 0x3ad   : > { %p1803_p4 = scmp.lt.u32.totalorder %s1801_s23, %s1797_s24  ;;  %p1805_p8 = scmp.lt.u32.totalorder %s1797_s24, %s2517_s30 }
 0x3ae   : > { %p1799_p2 = pnand %p1798_p13, %p2589_p10 }
 0x3af   : > { %p1804_p5 = por %p1803_p4, %p1802_p12 }
 0x3b0   : > { %p1800_p6 = pneg %p1799_p2 }
 0x3b1   : > { %p1806_p11 = por %p1805_p8, %p1804_p5 }
 0x3b3   : > { %p1807_p1 = pnand %p1806_p11, %p1800_p6 }
 0x3b5   : > { %1810 = shalt.err (!%p1807_p1)
}
 0x3b6   : > { %s1882_s26 = smov 64   ;;  %s1883_s7 = smov 4  }
 0x3b7   : > { %1648 = dma.vmem_to_hbm [thread:$0]  (%p2589_p10), %s2512_s15, 256, %s2517_s30, %s1500_s27, %s1882_s26, %s1882_s26, %s1883_s7  }
 0x3b8 PF: > { %s1530_s29 = sand.u32 1, %s1849_s9   ;;  %p2590_p0 = scmp.ne.s32.totalorder %s2579_s22, 0 }
 0x3b9   : > { %p2591_p9 = scmp.ge.s32.totalorder %s1869_s14, 2  ;;  %s1531_s5 = scalar_lea.sflag [#allocation4], %s1530_s29 }
 0x3bb   : > { %p1659_p3 = pnand %p2591_p9, %p2590_p0 }
 0x3bd   : > { %1844 = dma.done.wait (!%p1659_p3), %s1531_s5, 256  }
 0x3be   : > { %1846 = vsyncadd (!%p1659_p3), %s1531_s5, 4294967040  ;;  %s19_s14 = sadd.s32 1, %s1869_s14   ;;  %s2592_s9 = smov %s1853_s10 }
 0x3bf   : > { %p16_p7 = scmp.ge.s32.totalorder %s19_s14, 4   ;;  %s2593_s10 = smov %s1857_s11 }
 0x3c0   : > { %s2594_s11 = smov %s2018_s25  ;;  %s2595_s12 = smov %s1865_s13 }
 0x3c1   : > { %s2596_s13 = smov %s2598_s28  ;;  %18 = sbr.rel (!%p16_p7) target bundleno = 7 (0x7), region = 77 }
 0x3c8   :  { %1536 = vsyncpa [#allocation3], 1 }
 0x3c9   :  { %1538 = vsyncpa [#allocation3 + $0x1], 1 }
 0x3ca   :  { %1539 = vsyncpa [#allocation6], 1 }
 0x3cb   :  { %1540 = vsyncpa [#allocation4], 1 }
 0x3cc   :  { %1542 = vsyncpa [#allocation4 + $0x1], 1 }

</bundles_post_ra>
